<compile_context>
chip_gen: v7x
topology: tpu7x:2x2x1
jax: 0.10.0
libtpu: 0.0.40
codegen_flags: <defaults>
</compile_context>

<pallas_src>
import functools

import jax
import jax.numpy as jnp
from jax.experimental import pallas as pl
from jax.experimental.pallas import tpu as pltpu


def _round_up(n: int, m: int) -> int:
    return ((n + m - 1) // m) * m


# ----------------------------- Pallas kernel --------------------------------

def _denoise_mlp_kernel(x_ref, cond_ref, w1_ref, b1_ref, w2_ref, b2_ref, o_ref):
    """Fused conditional MLP:  out = x + relu(x@W1 + b1 + cond) @ W2 + b2.

    x_ref   : (tt, F)  bf16   row tile
    cond_ref: (1,  H)  bf16   per-batch conditioning (broadcast over rows)
    w1_ref  : (F,  H)  bf16   resident
    b1_ref  : (1,  H)  f32
    w2_ref  : (H,  F)  bf16   resident
    b2_ref  : (1,  F)  f32
    o_ref   : (tt, F)  f32 (caller dtype)
    """
    x = x_ref[...]                                                     # bf16
    h = jnp.dot(x, w1_ref[...], preferred_element_type=jnp.float32)    # MXU -> f32
    h = h + b1_ref[...] + cond_ref[...].astype(jnp.float32)            # VPU, f32
    h = jnp.maximum(h, 0.0)                                            # relu
    y = jnp.dot(h.astype(jnp.bfloat16), w2_ref[...],
                preferred_element_type=jnp.float32)                    # MXU -> f32
    y = y + b2_ref[...] + x.astype(jnp.float32)                        # residual in f32
    o_ref[...] = y.astype(o_ref.dtype)


def denoise_mlp(x2d, cond, w1, b1, w2, b2, *, batch, row_tile, out_dtype):
    """x2d:(B*T_pad, F) bf16, cond:(B,1,H) bf16 -> (B*T_pad, F) out_dtype.

    Grid = (B, T_tiles); cond is indexed per-batch (no (N,H) duplication in HBM),
    weights/biases stay resident in VMEM.
    """
    N, F = x2d.shape
    H = w1.shape[1]
    assert N % batch == 0
    rows_per_batch = N // batch
    tt = row_tile
    assert rows_per_batch % tt == 0, "wrapper must pad T to a multiple of the row tile"
    t_tiles = rows_per_batch // tt

    return pl.pallas_call(
        _denoise_mlp_kernel,
        out_shape=jax.ShapeDtypeStruct((N, F), out_dtype),
        grid_spec=pltpu.PrefetchScalarGridSpec(
            num_scalar_prefetch=0,
            grid=(batch, t_tiles),
            in_specs=[
                pl.BlockSpec((tt, F), lambda b, i: (b * t_tiles + i, 0)),   # x rows
                pl.BlockSpec((None, 1, H), lambda b, i: (b, 0, 0)),         # cond (per batch)
                pl.BlockSpec((F, H), lambda b, i: (0, 0)),                  # W1 (resident)
                pl.BlockSpec((1, H), lambda b, i: (0, 0)),                  # b1
                pl.BlockSpec((H, F), lambda b, i: (0, 0)),                  # W2 (resident)
                pl.BlockSpec((1, F), lambda b, i: (0, 0)),                  # b2
            ],
            out_specs=pl.BlockSpec((tt, F), lambda b, i: (b * t_tiles + i, 0)),
        ),
        compiler_params=pltpu.CompilerParams(
            dimension_semantics=("parallel", "parallel")),
    )(x2d, cond, w1, b1, w2, b2)


# ----------------------------- Model wrapper ---------------------------------

class BaseConversionModelPallas:
    """Concrete JAX/Pallas realization of BaseConversionModel's denoiser forward."""

    def __init__(self, num_accents: int, feature_dim: int, hidden_dim: int = 128,
                 seed: int = 0, row_tile: int = 512):
        self.num_accents = num_accents
        self.feature_dim = feature_dim
        self.hidden_dim = hidden_dim
        self.row_tile = row_tile

        k = jax.random.PRNGKey(seed)
        k_emb, k_w1, k_w2 = jax.random.split(k, 3)
        # Deterministic parameter init (synthetic; no checkpoint load).
        self.accent_embed = (
            jax.random.normal(k_emb, (num_accents, hidden_dim), jnp.float32) * 0.02)
        # Matmul weights stored in bf16 (MXU-native; halves streaming bytes).
        self.w1 = (jax.random.normal(k_w1, (feature_dim, hidden_dim), jnp.float32)
                   * (1.0 / jnp.sqrt(feature_dim))).astype(jnp.bfloat16)
        self.b1 = jnp.zeros((1, hidden_dim), jnp.float32)
        self.w2 = (jax.random.normal(k_w2, (hidden_dim, feature_dim), jnp.float32)
                   * (1.0 / jnp.sqrt(hidden_dim))).astype(jnp.bfloat16)
        self.b2 = jnp.zeros((1, feature_dim), jnp.float32)

    def _time_embed(self, t):
        """Sinusoidal timestep embedding -> (B, hidden_dim).  Tiny; plain-JAX glue."""
        half = self.hidden_dim // 2
        freqs = jnp.exp(
            -jnp.log(10000.0) * jnp.arange(half, dtype=jnp.float32) / half)
        args = t.astype(jnp.float32)[:, None] * freqs[None, :]              # (B, half)
        return jnp.concatenate([jnp.sin(args), jnp.cos(args)], axis=-1)     # (B, H)

    @functools.partial(jax.jit, static_argnums=0)
    def forward(self, x, t, accent_ids):
        """x:(B,T,F) float32, t:(B,), accent_ids:(B,) int32 -> (B,T,F) float32."""
        B, T, F = x.shape
        assert F == self.feature_dim
        H = self.hidden_dim

        # Per-batch conditioning vector (glue, tiny) -> (B, 1, H) bf16.
        cond = self.accent_embed[accent_ids] + self._time_embed(t)           # (B, H) f32
        cond = cond.astype(jnp.bfloat16)[:, None, :]                         # (B, 1, H)

        # Row tile: large by default; pad T (zeros) so every batch has whole tiles.
        tt = min(self.row_tile, _round_up(T, 8))
        T_pad = _round_up(T, tt)
        xb = x.astype(jnp.bfloat16)
        if T_pad != T:
            xb = jnp.pad(xb, ((0, 0), (0, T_pad - T), (0, 0)))
        x2d = xb.reshape(B * T_pad, F)

        out2d = denoise_mlp(x2d, cond, self.w1, self.b1, self.w2, self.b2,
                            batch=B, row_tile=tt, out_dtype=x.dtype)
        return out2d.reshape(B, T_pad, F)[:, :T, :]

    # TODO(synk): convert() (numpy reverse-diffusion sampling loop) and loss_fn()
    # (training objective) are abstract host-side procedures, not single-kernel
    # hot paths; only the forward denoiser is implemented as a Pallas kernel.


# Pure-JAX reference (mirrors the kernel's bf16 storage / f32 accumulation).
def _forward_ref(model, x, t, accent_ids):
    B, T, F = x.shape
    cond = (model.accent_embed[accent_ids] + model._time_embed(t)).astype(jnp.bfloat16)
    xb = x.astype(jnp.bfloat16).reshape(B * T, F)
    cond_rows = jnp.repeat(cond, T, axis=0)                                  # (B*T, H)
    h = jnp.dot(xb, model.w1, preferred_element_type=jnp.float32)
    h = h + model.b1 + cond_rows.astype(jnp.float32)
    h = jnp.maximum(h, 0.0)
    y = jnp.dot(h.astype(jnp.bfloat16), model.w2, preferred_element_type=jnp.float32)
    y = y + model.b2 + xb.astype(jnp.float32)
    return y.reshape(B, T, F).astype(x.dtype)


if __name__ == "__main__":
    num_accents, feature_dim, hidden_dim = 4, 32, 128
    B, T = 2, 8

    model = BaseConversionModelPallas(num_accents, feature_dim, hidden_dim, seed=0)

    key = jax.random.PRNGKey(0)
    kx, kt, ka = jax.random.split(key, 3)
    x = jax.random.normal(kx, (B, T, feature_dim), jnp.float32)
    t = jax.random.randint(kt, (B,), 0, 1000).astype(jnp.float32)
    accent_ids = jax.random.randint(ka, (B,), 0, num_accents)

    out = model.forward(x, t, accent_ids)
    jax.block_until_ready(out)

    ref = _forward_ref(model, x, t, accent_ids)
    assert out.shape == (B, T, feature_dim)
    assert out.dtype == x.dtype
    assert jnp.allclose(out, ref, atol=5e-3, rtol=5e-3), "mismatch vs reference"

    print("KERNEL_OK")
</pallas_src>

<mosaic_0001>
module attributes {stable_mosaic.version = 11 : i64} {
  func.func @_denoise_mlp_kernel(%arg0: i32, %arg1: i32, %arg2: memref<8x32xbf16, #tpu.memory_space<vmem>>, %arg3: memref<1x1x128xbf16, #tpu.memory_space<vmem>>, %arg4: memref<32x128xbf16, #tpu.memory_space<vmem>>, %arg5: memref<1x128xf32, #tpu.memory_space<vmem>>, %arg6: memref<128x32xbf16, #tpu.memory_space<vmem>>, %arg7: memref<1x32xf32, #tpu.memory_space<vmem>>, %arg8: memref<8x32xf32, #tpu.memory_space<vmem>>) attributes {dimension_semantics = [#tpu.dimension_semantics<parallel>, #tpu.dimension_semantics<parallel>], iteration_bounds = array<i64: 2, 1>, scalar_prefetch = 0 : i64, scratch_operands = 0 : i64, tpu.core_type = #tpu.core_type<tc>, window_params = [{transform_indices = @transform_0, window_bounds = array<i64: 8, 32>}, {transform_indices = @transform_1, window_bounds = array<i64: 1, 1, 128>}, {pipeline_mode = #tpu.pipeline_mode<synchronous>, transform_indices = @transform_2, window_bounds = array<i64: 32, 128>}, {pipeline_mode = #tpu.pipeline_mode<synchronous>, transform_indices = @transform_3, window_bounds = array<i64: 1, 128>}, {pipeline_mode = #tpu.pipeline_mode<synchronous>, transform_indices = @transform_4, window_bounds = array<i64: 128, 32>}, {pipeline_mode = #tpu.pipeline_mode<synchronous>, transform_indices = @transform_5, window_bounds = array<i64: 1, 32>}, {transform_indices = @transform_6, window_bounds = array<i64: 8, 32>}]} {
    %c0 = arith.constant 0 : index
    %c0_0 = arith.constant 0 : index
    %0 = vector.load %arg2[%c0, %c0_0] : memref<8x32xbf16, #tpu.memory_space<vmem>>, vector<8x32xbf16>
    %c0_1 = arith.constant 0 : index
    %c0_2 = arith.constant 0 : index
    %1 = vector.load %arg4[%c0_1, %c0_2] : memref<32x128xbf16, #tpu.memory_space<vmem>>, vector<32x128xbf16>
    %cst = arith.constant dense<0.000000e+00> : vector<8x128xf32>
    %2 = tpu.matmul %0, %1, %cst {dimension_numbers = #tpu.dot_dimension_numbers<[1], [0], [0], [1], [0, 0, 1, 1], [], []>} : vector<8x32xbf16>, vector<32x128xbf16>, vector<8x128xf32> -> vector<8x128xf32>
    %c0_3 = arith.constant 0 : index
    %c0_4 = arith.constant 0 : index
    %3 = vector.load %arg5[%c0_3, %c0_4] : memref<1x128xf32, #tpu.memory_space<vmem>>, vector<1x128xf32>
    %4 = vector.broadcast %3 : vector<1x128xf32> to vector<8x128xf32>
    %5 = arith.addf %2, %4 : vector<8x128xf32>
    %c0_5 = arith.constant 0 : index
    %c0_6 = arith.constant 0 : index
    %c0_7 = arith.constant 0 : index
    %6 = vector.load %arg3[%c0_5, %c0_6, %c0_7] : memref<1x1x128xbf16, #tpu.memory_space<vmem>>, vector<1x1x128xbf16>
    %7 = vector.shape_cast %6 : vector<1x1x128xbf16> to vector<1x128xbf16>
    %8 = arith.extf %7 : vector<1x128xbf16> to vector<1x128xf32>
    %9 = vector.broadcast %8 : vector<1x128xf32> to vector<8x128xf32>
    %10 = arith.addf %5, %9 : vector<8x128xf32>
    %cst_8 = arith.constant 0.000000e+00 : f32
    %11 = vector.broadcast %cst_8 : f32 to vector<8x128xf32>
    %12 = arith.maximumf %10, %11 : vector<8x128xf32>
    %13 = arith.truncf %12 : vector<8x128xf32> to vector<8x128xbf16>
    %c0_9 = arith.constant 0 : index
    %c0_10 = arith.constant 0 : index
    %14 = vector.load %arg6[%c0_9, %c0_10] : memref<128x32xbf16, #tpu.memory_space<vmem>>, vector<128x32xbf16>
    %cst_11 = arith.constant dense<0.000000e+00> : vector<8x32xf32>
    %15 = tpu.matmul %13, %14, %cst_11 {dimension_numbers = #tpu.dot_dimension_numbers<[1], [0], [0], [1], [0, 0, 1, 1], [], []>} : vector<8x128xbf16>, vector<128x32xbf16>, vector<8x32xf32> -> vector<8x32xf32>
    %c0_12 = arith.constant 0 : index
    %c0_13 = arith.constant 0 : index
    %16 = vector.load %arg7[%c0_12, %c0_13] : memref<1x32xf32, #tpu.memory_space<vmem>>, vector<1x32xf32>
    %17 = vector.broadcast %16 : vector<1x32xf32> to vector<8x32xf32>
    %18 = arith.addf %15, %17 : vector<8x32xf32>
    %19 = arith.extf %0 : vector<8x32xbf16> to vector<8x32xf32>
    %20 = arith.addf %18, %19 : vector<8x32xf32>
    %c0_14 = arith.constant 0 : index
    %c0_15 = arith.constant 0 : index
    %21 = vector.load %arg8[%c0_14, %c0_15] : memref<8x32xf32, #tpu.memory_space<vmem>>, vector<8x32xf32>
    tpu.vector_store %arg8[%c0_14, %c0_15], %20 {strides = array<i32>} : memref<8x32xf32, #tpu.memory_space<vmem>>, vector<8x32xf32>,
    return
  }
  func.func @transform_0(%arg0: i32, %arg1: i32) -> (i32, i32) {
    %c1_i32 = arith.constant 1 : i32
    %0 = arith.muli %arg0, %c1_i32 : i32
    %1 = arith.addi %0, %arg1 : i32
    %c0_i32 = arith.constant 0 : i32
    %c0_i32_0 = arith.constant 0 : i32
    return %1, %c0_i32 : i32, i32
  }
  func.func @transform_1(%arg0: i32, %arg1: i32) -> (i32, i32, i32) {
    %c0_i32 = arith.constant 0 : i32
    %c0_i32_0 = arith.constant 0 : i32
    %c0_i32_1 = arith.constant 0 : i32
    return %arg0, %c0_i32, %c0_i32_0 : i32, i32, i32
  }
  func.func @transform_2(%arg0: i32, %arg1: i32) -> (i32, i32) {
    %c0_i32 = arith.constant 0 : i32
    %c0_i32_0 = arith.constant 0 : i32
    %c0_i32_1 = arith.constant 0 : i32
    return %c0_i32, %c0_i32_0 : i32, i32
  }
  func.func @transform_3(%arg0: i32, %arg1: i32) -> (i32, i32) {
    %c0_i32 = arith.constant 0 : i32
    %c0_i32_0 = arith.constant 0 : i32
    %c0_i32_1 = arith.constant 0 : i32
    return %c0_i32, %c0_i32_0 : i32, i32
  }
  func.func @transform_4(%arg0: i32, %arg1: i32) -> (i32, i32) {
    %c0_i32 = arith.constant 0 : i32
    %c0_i32_0 = arith.constant 0 : i32
    %c0_i32_1 = arith.constant 0 : i32
    return %c0_i32, %c0_i32_0 : i32, i32
  }
  func.func @transform_5(%arg0: i32, %arg1: i32) -> (i32, i32) {
    %c0_i32 = arith.constant 0 : i32
    %c0_i32_0 = arith.constant 0 : i32
    %c0_i32_1 = arith.constant 0 : i32
    return %c0_i32, %c0_i32_0 : i32, i32
  }
  func.func @transform_6(%arg0: i32, %arg1: i32) -> (i32, i32) {
    %c1_i32 = arith.constant 1 : i32
    %0 = arith.muli %arg0, %c1_i32 : i32
    %1 = arith.addi %0, %arg1 : i32
    %c0_i32 = arith.constant 0 : i32
    %c0_i32_0 = arith.constant 0 : i32
    return %1, %c0_i32 : i32, i32
  }
}

</mosaic_0001>

<bundles_post_ra>
// kernel: forward.1
= control target key start
LH: loop header
LB: loop body
LE: loop exit
PB: predicated region body
PF: predicated region fallthrough
CT: control target
= control target key end

     0   :  { %11 = vsyncpa [#allocation3], 0  ;;  %s973_s0 = inlined_call_operand.vmem [shape: bf16[16,32], index: 0, kind: input, shape index: {}]   ;;  %s974_s1 = inlined_call_operand.vmem [shape: bf16[2,1,128], index: 1, kind: input, shape index: {}]   ;;  %s975_s2 = inlined_call_operand.vmem [shape: bf16[32,128], index: 2, kind: input, shape index: {}]   ;;  %s976_s3 = inlined_call_operand.vmem [shape: f32[1,128], index: 3, kind: input, shape index: {}]   ;;  %s977_s4 = inlined_call_operand.vmem [shape: bf16[128,32], index: 4, kind: input, shape index: {}]   ;;  %s978_s5 = inlined_call_operand.vmem [shape: f32[1,32], index: 5, kind: input, shape index: {}]   ;;  %s979_s6 = inlined_call_operand.hbm [shape: f32[16,32], index: 6, kind: output, shape index: {}]  }
   0x1   :  { %13 = vsyncpa [#allocation3 + $0x1], 0  ;;  %s816_s21 = smov 0   ;;  %s818_s22 = smov 0  }
   0x2   :  { %s820_s23 = smov 0   ;;  %s822_s24 = smov 0  }
   0x3   :  { %s824_s25 = smov 0   ;;  %s826_s26 = smov 0  }
   0x4 LB: > { %s567_s27 = sadd.s32 4294967295, %s776_s26   ;;  %s568_s28 = sadd.s32 4294967294, %s776_s26   ;;  %s776_s26 = sphi %s826_s26, %s19_s26   ;;  %s772_s25 = sphi %s824_s25, %s986_s25   ;;  %s768_s24 = sphi %s822_s24, %s985_s24   ;;  %s764_s23 = sphi %s820_s23, %s984_s23   ;;  %s760_s22 = sphi %s818_s22, %s983_s22   ;;  %s756_s21 = sphi %s816_s21, %s982_s21  }
   0x5   : > { %s31_s29 = sadd.s32 1, %s772_s25  ;;  %s178_s30 = sadd.s32 1, %s764_s23 }
   0x6   : > { %p33_p0 = scmp.ge.s32.totalorder %s31_s29, 2  ;;  %p188_p1 = scmp.ne.s32.totalorder %s764_s23, %s760_s22 }
   0x7   : > { %p189_p2 = scmp.eq.s32.totalorder %s567_s27, 1  ;;  %p194_p3 = scmp.ne.s32.totalorder %s760_s22, %s756_s21 }
   0x8   : > { %s988_s29 = smov (%p33_p0, %s31_s29), 0  ;;  %p195_p5 = scmp.eq.s32.totalorder %s568_s28, 1 }
   0x9   : > { %p856_p4 = por %p189_p2, %p188_p1  ;;  %s175_s8 = ssub.s32 %s772_s25, %s988_s29 }
   0xa   : > { %p571_p6 = scmp.ge.s32.totalorder %s776_s26, 1  ;;  %p176_p7 = scmp.eq.s32.totalorder %s175_s8, 0 }
   0xb   : > { %p863_p8 = por %p195_p5, %p194_p3  ;;  %p240_p9 = scmp.lt.s32.totalorder %s776_s26, 3 }
   0xc   : > { %s869_s10 = scalar_select %p176_p7, %s764_s23, %s178_s30  }
   0xd   : > { %p241_p10 = pnand %p571_p6, %p240_p9 }
   0xe   : > { %v688_v0 = vld [vmem:[%s975_s2] sm:$0xff] (!%p241_p10)   ;;  %v778_v1 = vmov (!%p241_p10), 0.0   ;;  %v689_v2 = vld [vmem:[%s975_s2 + $0x8] sm:$0xff] (!%p241_p10)   ;;  %vm779_vm0 = vmmov (!%p241_p10), 0   ;;  %p274_p11 = scmp.lt.s32.totalorder (!%p241_p10), %s768_s24, 1  ;;  %vm308_vm1 = vcmask (!%p241_p10), 261120   ;;  %v354_v12 = vlaneseq (!%p241_p10) }
   0xf   : > { %244 = sbr.rel (%p241_p10) target bundleno = 477 (0x1dd), region = 44  ;;  %603 = vmatprep.subr.bf16.mxu0 (!%p241_p10), %v778_v1  ;;  %611 = vmatprep.subr.bf16.mxu1 (!%p241_p10), %v778_v1  ;;  %v690_v3 = vld [vmem:[%s977_s4] sm:$0xff] (!%p241_p10)   ;;  %v691_v4 = vld [vmem:[%s977_s4 + $0x8] sm:$0xff] (!%p241_p10)   ;;  %v692_v6 = vld [vmem:[%s977_s4 + $0x10] sm:$0xff] (!%p241_p10)   ;;  %s588_s18 = sshll.u32 (!%p241_p10), %s768_s24, 7 }
  0x10   : > { %604 = vmatpush3.bf16.msra.mxu0 (!%p241_p10), %v688_v0  ;;  %607 = vmatprep.mubr.msk.bf16.mxu0 (!%p241_p10), %vm779_vm0, %v778_v1  ;;  %v693_v7 = vld [vmem:[%s977_s4 + $0x18] sm:$0xff] (!%p241_p10)   ;;  %v694_v8 = vld [vmem:[%s977_s4 + $0x20] sm:$0xff] (!%p241_p10)   ;;  %v695_v9 = vld [vmem:[%s977_s4 + $0x28] sm:$0xff] (!%p241_p10)   ;;  %v355_v13 = vshrl.u32 (!%p241_p10), %v354_v12, 7 }
  0x11   : > { %605 = vmatprep.subr.bf16.mxu0 (!%p241_p10), %v778_v1  ;;  %627 = vmatprep.mubr.msk.bf16.mxu1 (!%p241_p10), %vm779_vm0, %v778_v1  ;;  %v696_v10 = vld [vmem:[%s977_s4 + $0x30] sm:$0xff] (!%p241_p10)   ;;  %v697_v11 = vld [vmem:[%s977_s4 + $0x38] sm:$0xff] (!%p241_p10)   ;;  %v574_v17 = vld [vmem:[%s976_s3] ss:$0 sm:$0xff] (!%p241_p10) }
  0x12   : > { %612 = vmatpush3.bf16.msra.mxu1 (!%p241_p10), %v690_v3  ;;  %v356_v16 = vsub.s32 (!%p241_p10), 0, %v355_v13  ;;  %v578_v27 = vld [vmem:[%s978_s5] ss:$0 sm:$0xff] (!%p241_p10) }
  0x13   : > { %613 = vmatprep.subr.bf16.mxu1 (!%p241_p10), %v778_v1 }
  0x14   : > { %606 = vmatpush3.bf16.msra.mxu0 (!%p241_p10), %v689_v2 }
  0x16   : > { %s882_s17 = scalar_select %p274_p11, %s768_s24, 1  ;;  %614 = vmatpush3.bf16.msra.mxu1 %v691_v4 }
  0x17   : > { %615 = vmatprep.subr.bf16.mxu1 %v778_v1 }
  0x18   : > { %s573_s20 = sshll.u32 %s882_s17, 2  ;;  %s281_s11 = scalar_lea.vmem %s974_s1, %s882_s17 }
  0x19   : > { %s277_s30 = scalar_lea.vmem %s973_s0, %s573_s20  ;;  %v352_v14 = vld [vmem:[%s281_s11] sm:$0x1]  ;;  %s270_s17 = sand.u32 1, %s760_s22  }
  0x1a   : > { %v284_v5 = vld [vmem:[%s277_s30] sm:$0xf]  ;;  %616 = vmatpush3.bf16.msra.mxu1 %v692_v6  ;;  %v353_v15 = vunpack.c.l.bf16 %v352_v14  ;;  %s572_s14 = sshll.u32 %s270_s17, 3  ;;  %s925_s30 = scalar_lea.hbm %s979_s6, %s588_s18 }
  0x1b   : > { %608 = vmatmul.mubr.msk.bf16.vlgmr.msra.gmra.mrb[0].mxu0 %vm308_vm1, %v284_v5  ;;  %617 = vmatprep.subr.bf16.mxu1 %v778_v1  ;;  %v472_v28 = vunpack.c.l.bf16 %v284_v5  ;;  %s272_s19 = scalar_lea.vmem [#allocation2], %s572_s14  ;;  %s476_s24 = scalar_lea.sflag [#allocation3], %s270_s17 }
  0x1c   : > { %v357_v18 = vrot.slane %v353_v15, %v356_v16  ;;  %s490_s20 = sshll.u32 %s272_s19, 4  ;;  %s780_s11 = smov [#allocation2]   ;;  %s927_s20 = int_to_ptr.vmem [resolvable:$true] %s490_s20 }
  0x1d   : > { %s698_s8 = scalar_lea.vmem %s927_s20, 128  ;;  %s702_s12 = sshll.u32 %s780_s11, 4  ;;  %s703_s12 = int_to_ptr.vmem [resolvable:$false] %s702_s12 }
  0x1e   : > { %618 = vmatpush3.bf16.msra.mxu1 %v693_v7  ;;  %p699_p12 = scmp.ne.s32.totalorder %s927_s20, %s698_s8  ;;  %s704_s13 = scalar_lea.vmem %s703_s12, 256 }
  0x1f   : > { %619 = vmatprep.subr.bf16.mxu1 %v778_v1  ;;  %p705_p1 = scmp.lt.s32.totalorder %s927_s20, %s703_s12  ;;  %p706_p2 = scmp.lt.s32.totalorder %s704_s13, %s698_s8 }
  0x20   : > { %p700_p13 = pnand %p699_p12, %p856_p4 }
  0x21   : > { %p707_p3 = por %p706_p2, %p705_p1 }
  0x22   : > { %620 = vmatpush3.bf16.msra.mxu1 %v694_v8  ;;  %p701_p0 = pneg %p700_p13 }
  0x23   : > { %621 = vmatprep.subr.bf16.mxu1 %v778_v1 }
  0x24   : > { %p708_p5 = pnand %p707_p3, %p701_p0 }
  0x26   : > { %622 = vmatpush3.bf16.msra.mxu1 %v695_v9 }
  0x27   : > { %623 = vmatprep.subr.bf16.mxu1 %v778_v1 }
  0x2a   : > { %624 = vmatpush3.bf16.msra.mxu1 %v696_v10 }
  0x2b   : > { %625 = vmatprep.subr.bf16.mxu1 %v778_v1 }
  0x2e   : > { %626 = vmatpush3.bf16.msra.mxu1 %v697_v11 }
  0xee   : > { %v346_v19 = vpop.f32.mrb[0].mxu0 }
  0xef   : > { %v347_v20 = vadd.f32 %v574_v17, %v346_v19  ;;  %v609_v21 = vpop.f32.mrb[1].mxu0 }
  0xf0   : > { %v349_v22 = vpop.f32.mrb[2].mxu0 }
  0xf1   : > { %v358_v23 = vadd.f32 %v357_v18, %v347_v20  ;;  %v610_v24 = vpop.f32.mrb[3].mxu0 }
  0xf3   : > { %v359_v25 = vmax.f32 %v358_v23, 0.0 }
  0xf5   : > { %v360_v26 = vpack.c.bf16 %v359_v25, %v359_v25 }
  0xf7   : > { %628 = vmatmul.mubr.bf16.vlgmr.msra.gmra.mrb[0].mxu1 %v360_v26 }
 0x1ca   : > { %v466_v29 = vpop.f32.mrb[0].mxu1 }
 0x1cb   : > { %v467_v30 = vadd.f32 %v578_v27, %v466_v29  ;;  %v629_v31 = vpop.f32.mrb[1].mxu1 }
 0x1cc   : > { %v469_v32 = vpop.f32.mrb[2].mxu1 }
 0x1cd   : > { %v473_v33 = vadd.f32 %v472_v28, %v467_v30  ;;  %v630_v34 = vpop.f32.mrb[3].mxu1 }
 0x1cf   : > { %474 = vst.msk [vmem:[%s272_s19] sm:$0xff] %vm308_vm1, %v473_v33 }
 0x1d0   : > { %711 = shalt.err (!%p708_p5)
}
 0x1d1   : > { %s712_s17 = scalar_lea.hbm %s925_s30, 128  ;;  %s716_s16 = scalar_lea.hbm %s979_s6, 256 }
 0x1d2   : > { %p713_p6 = scmp.ne.s32.totalorder %s925_s30, %s712_s17  ;;  %p717_p10 = scmp.lt.u32.totalorder %s925_s30, %s979_s6 }
 0x1d3   : > { %p718_p11 = scmp.lt.u32.totalorder %s716_s16, %s712_s17  ;;  %p720_p13 = scmp.lt.u32.totalorder %s712_s17, %s925_s30 }
 0x1d4   : > { %p714_p7 = pnand %p713_p6, %p856_p4 }
 0x1d5   : > { %p719_p12 = por %p718_p11, %p717_p10 }
 0x1d6   : > { %p715_p9 = pneg %p714_p7 }
 0x1d7   : > { %p721_p0 = por %p720_p13, %p719_p12 }
 0x1d9   : > { %p722_p1 = pnand %p721_p0, %p715_p9 }
 0x1db   : > { %725 = shalt.err (!%p722_p1)
}
 0x1dc   : > { %631 = dma.vmem_to_hbm [thread:$0]  (%p856_p4), %s927_s20, 128, %s925_s30, %s476_s24  }
 0x1dd PF: > { %p637_p2 = scmp.ge.s32.totalorder %s776_s26, 2  ;;  %s502_s27 = sand.u32 1, %s756_s21  }
 0x1de   : > { %s503_s28 = scalar_lea.sflag [#allocation3], %s502_s27 }
 0x1df   : > { %p634_p3 = pnand %p637_p2, %p863_p8 }
 0x1e1   : > { %751 = dma.done.wait (!%p634_p3), %s503_s28, 128  }
 0x1e2   : > { %753 = vsyncadd (!%p634_p3), %s503_s28, 4294967168  ;;  %s19_s26 = sadd.s32 1, %s776_s26   ;;  %s982_s21 = smov %s760_s22 }
 0x1e3   : > { %p16_p5 = scmp.ge.s32.totalorder %s19_s26, 4   ;;  %s983_s22 = smov %s764_s23 }
 0x1e4   : > { %s984_s23 = smov %s869_s10  ;;  %s985_s24 = smov %s772_s25 }
 0x1e5   : > { %s986_s25 = smov %s988_s29  ;;  %18 = sbr.rel (!%p16_p5) target bundleno = 4 (0x4), region = 82 }
 0x1ec   :  { %508 = vsyncpa [#allocation3], 1 }
 0x1ed   :  { %510 = vsyncpa [#allocation3 + $0x1], 1 }

</bundles_post_ra>
